<compile_context>
chip_gen: v5e
topology: v5e:2x2
jax: 0.10.0
libtpu: 0.0.40
codegen_flags: <defaults>
</compile_context>

<pallas_src>
import functools

import jax
import jax.numpy as jnp
from jax.experimental import pallas as pl
from jax.experimental.pallas import tpu as pltpu


def _softplus_kernel(x_ref, o_ref, *, beta, inv_beta, threshold, margin,
                     compute_dtype):
    x = x_ref[...]
    xc = x.astype(compute_dtype)
    if beta == 1.0:
        # Specialized common case: no beta multiply, no 1/beta scale.
        bx = xc
        soft = jnp.log1p(jnp.exp(bx))
    else:
        bx = xc * beta
        soft = jnp.log1p(jnp.exp(bx)) * inv_beta
    # PyTorch Softplus semantics: linear passthrough where beta*x > threshold.
    # (The inf produced by exp on the unselected branch is masked by the where.)
    sp = jnp.where(bx > threshold, xc, soft)
    o_ref[...] = (sp + margin).astype(o_ref.dtype)


def _round_up(v, m):
    return -(-v // m) * m


def _block_budget():
    """(target block bytes, vmem limit bytes), TPU-generation aware."""
    vmem_cap = None
    try:
        vmem_cap = getattr(pltpu.get_tpu_info(), "vmem_capacity_bytes", None)
    except Exception:
        vmem_cap = None
    if vmem_cap is not None and vmem_cap <= 64 * 1024 * 1024:
        # v7x: 64 MiB VMEM/TC but 3.2 TB/s HBM -> 6 MiB blocks (4x = 24 MiB
        # double-buffered in+out), keep the scoped limit well under physical.
        return 6 * 1024 * 1024, 40 * 1024 * 1024
    # v5e / v6e: 128 MiB physical VMEM (v5e scoped default is only 16 MiB,
    # so the explicit limit matters there).
    return 8 * 1024 * 1024, 48 * 1024 * 1024


def _choose_block_rows(rows, row_tile, min_rows=32):
    if rows > row_tile:
        return row_tile
    if rows >= 2 * min_rows:
        # Force >=2 grid steps so the "parallel" axis can shard across v7x's
        # two TensorCores (neutral on single-TC v5e/v6e).
        half = -(-rows // 2)
        return _round_up(half, min_rows)
    return rows  # full-extent block, always legal


def custom_softplus(x, beta=1.0, threshold=20.0, margin=0.01):
    """softplus(x) + margin, elementwise, for any input shape (e.g. NCHW)."""
    orig_shape = x.shape
    dtype = x.dtype
    n = x.size
    if n == 0:
        return x

    itemsize = jnp.dtype(dtype).itemsize
    # Sub-32-bit floats and non-float dtypes: compute exp/log1p in f32.
    if jnp.issubdtype(dtype, jnp.floating) and itemsize >= 4:
        compute_dtype = dtype
    else:
        compute_dtype = jnp.float32

    target_block_bytes, vmem_limit = _block_budget()
    min_rows = 32  # multiple of every dtype's sublane requirement (8/16/32)

    beta_f = float(beta)
    threshold_f = float(threshold)
    margin_f = float(margin)

    kernel = functools.partial(
        _softplus_kernel,
        beta=beta_f,
        inv_beta=1.0 / beta_f,
        threshold=threshold_f,
        margin=margin_f,
        compute_dtype=compute_dtype,
    )

    def run(slab2d, block_rows, grid):
        rows, lane = slab2d.shape
        cost = pl.CostEstimate(
            flops=3 * rows * lane,
            transcendentals=2 * rows * lane,   # exp + log1p per element
            bytes_accessed=2 * rows * lane * itemsize,
        )
        return pl.pallas_call(
            kernel,
            out_shape=jax.ShapeDtypeStruct((rows, lane), dtype),
            grid_spec=pltpu.PrefetchScalarGridSpec(
                num_scalar_prefetch=0,
                grid=grid,
                in_specs=[pl.BlockSpec((block_rows, lane), lambda i: (i, 0))],
                out_specs=pl.BlockSpec((block_rows, lane), lambda i: (i, 0)),
            ),
            compiler_params=pltpu.CompilerParams(
                dimension_semantics=("parallel",),
                vmem_limit_bytes=vmem_limit,
            ),
            cost_estimate=cost,
        )(slab2d)

    # ---- Path A: size divisible by 128 -> lane-dense slab, zero-copy reshape.
    if n % 128 == 0:
        if n % 512 == 0:
            lane = 512
        elif n % 256 == 0:
            lane = 256
        else:
            lane = 128
        rows = n // lane
        slab = x.reshape(rows, lane)          # zero-copy, no padding
        row_tile = max(min_rows,
                       (target_block_bytes // (lane * itemsize))
                       // min_rows * min_rows)
        block_rows = _choose_block_rows(rows, row_tile, min_rows)
        grid = (pl.cdiv(rows, block_rows),)   # ragged last block handled by Pallas
        out = run(slab, block_rows, grid)
        return out.reshape(orig_shape)

    # ---- Path B: small / awkward shapes -> one full-extent block (no (8,128)
    # requirement on full-extent dims), no padding, no extra HBM passes.
    if x.ndim >= 2:
        r2, c2 = n // orig_shape[-1], orig_shape[-1]
    else:
        r2, c2 = 1, n
    padded_footprint = _round_up(r2, 8) * _round_up(c2, 128) * 4
    if padded_footprint <= target_block_bytes:
        slab = x.reshape(r2, c2)              # zero-copy reshape
        out = run(slab, r2, (1,))
        return out.reshape(orig_shape)

    # ---- Path C: large and misaligned -> Pallas on the aligned bulk, plain
    # jnp on the <512-element tail (avoids full pad/slice passes over HBM).
    lane = 512
    flat = x.reshape(-1)
    bulk = (n // lane) * lane                 # > 0 here (n is large)
    rows = bulk // lane
    slab = flat[:bulk].reshape(rows, lane)
    row_tile = max(min_rows,
                   (target_block_bytes // (lane * itemsize))
                   // min_rows * min_rows)
    block_rows = _choose_block_rows(rows, row_tile, min_rows)
    bulk_out = run(slab, block_rows, (pl.cdiv(rows, block_rows),)).reshape(-1)

    tail = flat[bulk:].astype(compute_dtype)
    bt = tail if beta_f == 1.0 else tail * beta_f
    soft = jnp.log1p(jnp.exp(bt))
    if beta_f != 1.0:
        soft = soft * (1.0 / beta_f)
    tail_out = (jnp.where(bt > threshold_f, tail, soft) + margin_f).astype(dtype)

    return jnp.concatenate([bulk_out, tail_out]).reshape(orig_shape)


def _reference(x, beta=1.0, threshold=20.0, margin=0.01):
    bx = beta * x
    sp = jnp.where(bx > threshold, x, jnp.log1p(jnp.exp(bx)) / beta)
    return sp + margin


if __name__ == "__main__":
    key = jax.random.PRNGKey(0)

    # NCHW input, small shape (Path A, single full-extent block).
    x = jax.random.normal(key, (2, 4, 16, 16), dtype=jnp.float32) * 10.0
    y = jax.block_until_ready(custom_softplus(x, beta=1.0, threshold=20.0, margin=0.01))
    y_ref = _reference(x)
    assert y.shape == x.shape and y.dtype == x.dtype
    assert jnp.allclose(y, y_ref, atol=1e-5, rtol=1e-5)

    # Non-default beta + non-128-aligned size (Path B, full-extent block, no pad).
    x2 = jax.random.normal(jax.random.PRNGKey(1), (3, 5, 7), dtype=jnp.float32) * 5.0
    y2 = jax.block_until_ready(custom_softplus(x2, beta=2.0, threshold=20.0, margin=0.01))
    y2_ref = _reference(x2, beta=2.0)
    assert jnp.allclose(y2, y2_ref, atol=1e-5, rtol=1e-5)

    # Slightly larger aligned input to exercise a >=2-step "parallel" grid.
    x3 = jax.random.normal(jax.random.PRNGKey(2), (8, 4, 32, 32), dtype=jnp.float32) * 10.0
    y3 = jax.block_until_ready(custom_softplus(x3))
    y3_ref = _reference(x3)
    assert jnp.allclose(y3, y3_ref, atol=1e-5, rtol=1e-5)

    print("KERNEL_OK")
</pallas_src>

<mosaic_0001>
module attributes {stable_mosaic.version = 11 : i64} {
  func.func @_softplus_kernel(%arg0: i32, %arg1: memref<4x512xf32, #tpu.memory_space<vmem>>, %arg2: memref<4x512xf32, #tpu.memory_space<vmem>>) attributes {dimension_semantics = [#tpu.dimension_semantics<parallel>], iteration_bounds = array<i64: 1>, scalar_prefetch = 0 : i64, scratch_operands = 0 : i64, tpu.core_type = #tpu.core_type<tc>, window_params = [{transform_indices = @transform_0, window_bounds = array<i64: 4, 512>}, {transform_indices = @transform_1, window_bounds = array<i64: 4, 512>}]} {
    %c0 = arith.constant 0 : index
    %c0_0 = arith.constant 0 : index
    %0 = vector.load %arg1[%c0, %c0_0] : memref<4x512xf32, #tpu.memory_space<vmem>>, vector<4x512xf32>
    %1 = math.exp %0 : vector<4x512xf32>
    %2 = math.log1p %1 : vector<4x512xf32>
    %cst = arith.constant 2.000000e+01 : f32
    %3 = vector.broadcast %cst : f32 to vector<4x512xf32>
    %4 = arith.cmpf ogt, %0, %3 : vector<4x512xf32>
    %5 = arith.select %4, %0, %2 : vector<4x512xi1>, vector<4x512xf32>
    %cst_1 = arith.constant 0.00999999977 : f32
    %6 = vector.broadcast %cst_1 : f32 to vector<4x512xf32>
    %7 = arith.addf %5, %6 : vector<4x512xf32>
    %c0_2 = arith.constant 0 : index
    %c0_3 = arith.constant 0 : index
    %8 = vector.load %arg2[%c0_2, %c0_3] : memref<4x512xf32, #tpu.memory_space<vmem>>, vector<4x512xf32>
    tpu.vector_store %arg2[%c0_2, %c0_3], %7 {strides = array<i32>} : memref<4x512xf32, #tpu.memory_space<vmem>>, vector<4x512xf32>,
    return
  }
  func.func @transform_0(%arg0: i32) -> (i32, i32) {
    %c0_i32 = arith.constant 0 : i32
    %c0_i32_0 = arith.constant 0 : i32
    return %arg0, %c0_i32 : i32, i32
  }
  func.func @transform_1(%arg0: i32) -> (i32, i32) {
    %c0_i32 = arith.constant 0 : i32
    %c0_i32_0 = arith.constant 0 : i32
    return %arg0, %c0_i32 : i32, i32
  }
}

</mosaic_0001>

<bundles_post_ra>
// kernel: tpu_custom_call.1
= control target key start
LH: loop header
LB: loop body
LE: loop exit
PB: predicated region body
PF: predicated region fallthrough
CT: control target
= control target key end

     0   :  { %6 = vsyncpa [#allocation3], 0  ;;  %s152_s0 = inlined_call_operand.hbm [shape: f32[4,512], index: 0, kind: input, shape index: {}]   ;;  %s153_s1 = inlined_call_operand.hbm [shape: f32[4,512], index: 1, kind: output, shape index: {}]  }
   0x1   :  { %7 = vsyncpa [#allocation4], 0  ;;  %s13_s8 = sshll.u32 %s152_s0, 4  ;;  %s134_s9 = smov [#allocation2]   ;;  %s14_s8 = int_to_ptr.hbm [resolvable:$true] %s13_s8 }
   0x2   :  { %s15_s10 = sshll.u32 %s134_s9, 4  ;;  %s16_s10 = int_to_ptr.vmem [resolvable:$true] %s15_s10 }
   0x3   :  { %18 = dma.hbm_to_vmem [thread:$0]  %s14_s8, 256, %s16_s10, [#allocation3]  }
   0x4   :  { %130 = dma.done.wait [#allocation3], 256  }
   0x5   :  { %131 = vsyncadd [#allocation3], 4294967040  ;;  %v23_v0 = vld [vmem:[#allocation2] sm:$0xff]  ;;  %v24_v1 = vld [vmem:[#allocation2 + $0x8] sm:$0xff]  ;;  %s135_s0 = smov [#allocation5]   ;;  %s62_s14 = sshll.u32 %s153_s1, 4  ;;  %s63_s14 = int_to_ptr.hbm [resolvable:$true] %s62_s14 }
   0x6   :  { %v25_v2 = vmul.f32 1.442695, %v23_v0  ;;  %v27_v3 = vmul.f32 1.442695, %v24_v1  ;;  %vm47_vm1 = vcmp.gt.f32.partialorder %v23_v0, 20.0  ;;  %vm48_vm3 = vcmp.gt.f32.partialorder %v24_v1, 20.0 }
   0x7   :  { %s60_s11 = sshll.u32 %s135_s0, 4  ;;  %s61_s11 = int_to_ptr.vmem [resolvable:$true] %s60_s11 }
   0x8   :  { %74 = vpow2.f32 %v25_v2 }
   0x9   :  { %76 = vpow2.f32 %v27_v3 }
   0xe   :  { %v75_v4 = vpop.eup %74 }
   0xf   :  { %v77_v5 = vpop.eup %76  ;;  %v29_v6 = vadd.f32 1.0, %v75_v4  ;;  %v32_v7 = vmul.f32 -0.5, %v75_v4  ;;  %v35_v11 = vand.u32 2147483647, %v75_v4 }
  0x10   :  { %v38_v8 = vadd.f32 1.0, %v77_v5  ;;  %v41_v9 = vmul.f32 -0.5, %v77_v5  ;;  %v44_v13 = vand.u32 2147483647, %v77_v5 }
  0x11   :  { %78 = vlog2.f32 %v29_v6  ;;  %v33_v10 = vadd.f32 1.0, %v32_v7  ;;  %vm36_vm0 = vcmp.lt.f32.partialorder %v35_v11, 0.0004427343 }
  0x12   :  { %80 = vlog2.f32 %v38_v8  ;;  %v42_v12 = vadd.f32 1.0, %v41_v9  ;;  %vm45_vm2 = vcmp.lt.f32.partialorder %v44_v13, 0.0004427343 }
  0x13   :  { %v34_v14 = vmul.f32 %v75_v4, %v33_v10 }
  0x14   :  { %v43_v16 = vmul.f32 %v77_v5, %v42_v12 }
  0x17   :  { %v79_v15 = vpop.eup %78 }
  0x18   :  { %v81_v17 = vpop.eup %80  ;;  %v31_v18 = vmul.f32 0.6931472, %v79_v15 }
  0x19   :  { %v40_v19 = vmul.f32 0.6931472, %v81_v17 }
  0x1a   :  { %v37_v20 = vsel %vm36_vm0, %v34_v14, %v31_v18 }
  0x1b   :  { %v49_v21 = vsel %vm47_vm1, %v23_v0, %v37_v20  ;;  %v46_v22 = vsel %vm45_vm2, %v43_v16, %v40_v19 }
  0x1c   :  { %v51_v23 = vadd.f32 0.01, %v49_v21  ;;  %v50_v24 = vsel %vm48_vm3, %v24_v1, %v46_v22 }
  0x1d   :  { %v52_v25 = vadd.f32 0.01, %v50_v24 }
  0x1e   :  { %53 = vst [vmem:[#allocation5] sm:$0xff] %v51_v23 }
  0x1f   :  { %54 = vst [vmem:[#allocation5 + $0x8] sm:$0xff] %v52_v25 }
  0x20   :  { %65 = dma.vmem_to_hbm [thread:$0]  %s61_s11, 256, %s63_s14, [#allocation4]  }
  0x21   :  { %132 = dma.done.wait [#allocation4], 256  }
  0x22   :  { %133 = vsyncadd [#allocation4], 4294967040 }
  0x23   :  { %70 = vsyncpa [#allocation3], 1 }
  0x24   :  { %71 = vsyncpa [#allocation4], 1 }

</bundles_post_ra>
